<compile_context>
chip_gen: v7x
topology: tpu7x:2x2x1
jax: 0.10.0
libtpu: 0.0.40
codegen_flags: <defaults>
</compile_context>

<pallas_src>
import math

import jax
import jax.numpy as jnp
from jax.experimental import pallas as pl
from jax.experimental.pallas import tpu as pltpu

BN_EPS = 1e-5
SQRT_HALF = math.sqrt(0.5)


def feature_block_kernel(x_ref, w_ref, b_ref, gamma_ref, beta_ref, out_ref):
    """One channel-group tile.

    x_ref:     (D, CG*M)   input slab; columns = (channel, n, h), channel-major
    w_ref:     (D, D)      Linear weight in torch (out, in) layout
    b_ref:     (D, 1)      Linear bias
    gamma_ref: (1, CG)     BatchNorm2d weight for this channel group
    beta_ref:  (1, CG)     BatchNorm2d bias for this channel group
    out_ref:   (Dh, CG*M)  GLU halves the feature axis: Dh = D // 2
    """
    D, ncol = x_ref.shape
    Dh = D // 2
    cg = gamma_ref.shape[-1]
    m = ncol // cg                 # columns per channel (= N*H)
    count = float(m * D)           # BN reduces over (N, H, W') == (M, D) per channel

    x = x_ref[...].astype(jnp.float32)

    # ---- nn.Linear over the feature axis (rows here): a single 2-D MXU matmul.
    y = jnp.dot(w_ref[...], x, preferred_element_type=jnp.float32) + b_ref[...]

    # ---- 0/1 column<->channel segment matrices, generated IN-KERNEL (VPU iota+compare):
    # no HBM DMA, no VMEM double-buffering for them. Column col belongs to local channel
    # col // m, expressed as a pair of range compares (no integer division needed).
    lane = jax.lax.broadcasted_iota(jnp.int32, (ncol, cg), 0)
    chan = jax.lax.broadcasted_iota(jnp.int32, (ncol, cg), 1)
    sel = jnp.logical_and(lane >= chan * m, lane < (chan + 1) * m).astype(jnp.float32)
    chanT = jax.lax.broadcasted_iota(jnp.int32, (cg, ncol), 0)
    laneT = jax.lax.broadcasted_iota(jnp.int32, (cg, ncol), 1)
    selT = jnp.logical_and(laneT >= chanT * m,
                           laneT < (chanT + 1) * m).astype(jnp.float32)

    # ---- nn.BatchNorm2d (fresh module => training mode, biased batch stats).
    # Two-pass statistics (mean, then variance of centered values): numerically safer
    # than E[y^2] - mean^2 and the extra pass is cheap since y is VMEM-resident.
    s1 = jnp.sum(jnp.dot(y, sel, preferred_element_type=jnp.float32),
                 axis=0, keepdims=True)                                    # (1, CG)
    mean = s1 / count
    mean_c = jnp.dot(mean, selT, preferred_element_type=jnp.float32)       # (1, ncol)
    centered = y - mean_c
    s2 = jnp.sum(jnp.dot(centered * centered, sel,
                         preferred_element_type=jnp.float32),
                 axis=0, keepdims=True)                                    # (1, CG)
    var = s2 / count
    rstd = jax.lax.rsqrt(var + BN_EPS)
    scale = gamma_ref[...] * rstd                                          # (1, CG)

    # Per-channel scale & bias broadcast to columns with ONE stacked (2,CG)@(CG,ncol)
    # matmul (instead of two degenerate 1-row matmuls).
    sb = jnp.concatenate([scale, beta_ref[...]], axis=0)                   # (2, CG)
    sb_c = jnp.dot(sb, selT, preferred_element_type=jnp.float32)           # (2, ncol)
    yn = centered * sb_c[0:1, :] + sb_c[1:2, :]

    # ---- nn.GLU over the feature axis (rows here). Dh is a multiple of 8 for the
    # shapes used (D=16), so these sublane slices are tile-aligned (no relayout copies).
    glu = yn[:Dh, :] * jax.nn.sigmoid(yn[Dh:, :])

    # ---- residual add + sqrt(0.5) scaling.
    # TODO(synk): the reference `out += identity` is shape-incompatible as written
    # (identity feature dim D vs GLU output D//2) and `torch.sqrt(0.5)` is not valid
    # PyTorch; we add the matching leading D//2 slice of the identity and scale by
    # the scalar sqrt(0.5).
    out = (glu + x[:Dh, :]) * SQRT_HALF
    out_ref[...] = out.astype(out_ref.dtype)


def _pick_channels_per_tile(C, M, D, itemsize, tile_budget, *, lane_target=128,
                            max_lanes=8192, min_lanes_for_split=1024):
    """Largest channel group per tile that:
      (a) keeps tiles lane-dense (CG*M % 128 == 0  ->  unmasked vst output stores),
      (b) fits the per-tile VMEM budget (input/output blocks are double-buffered),
      (c) stays under ~8K lanes (the kernel is memory-bound; wider tiles buy nothing
          and only inflate the auxiliary segment-matmul work relative to the Linear),
      (d) when it costs no meaningful tile width, leaves >= 2 channel groups so the
          'parallel' grid axis can span both v7x TensorCores.
    """
    def footprint(g):
        ncol = g * M
        blocks = 2 * (D + D // 2) * ncol * itemsize          # double-buffered x/out tiles
        temps = 5 * D * ncol * 4 + 2 * g * ncol * 4          # f32 y/centered/sq/yn/out + sel/selT
        params = 2 * (D * D + D + 2 * g) * itemsize
        return blocks + temps + params

    divisors = [g for g in range(C, 0, -1) if C % g == 0]    # descending
    lane_dense = [g for g in divisors if (g * M) % lane_target == 0]
    # TODO(synk): if no lane-dense divisor exists, pad M (=N*H) up to a 128 multiple with
    # count-corrected BN statistics instead of accepting masked vst partial stores.
    cands = lane_dense if lane_dense else divisors
    fit = [g for g in cands if footprint(g) <= tile_budget] or [cands[-1]]
    capped = [g for g in fit if g * M <= max_lanes] or [fit[-1]]
    split = [g for g in capped if C // g >= 2 and g * M >= min_lanes_for_split]
    pool = split if split else capped
    return max(pool)


def feature_block(x_nchw, weights, biases, gammas, betas):
    """x_nchw: (N, C, H, W) with C == W == input_size.
    weights: (S, D, D) torch Linear layout (out, in); biases: (S, D);
    gammas/betas: (S, C).  Returns (N, C, H, D // 2).

    Only the last sub-block's parameters matter: the torch loop computes every
    sub-block from the *original* X and overwrites `out`, so s < S-1 is dead work."""
    N, C, H, W = x_nchw.shape
    D = W
    Dh = D // 2
    M = N * H

    w = weights[-1]                         # (D, D) torch (out, in): y = W @ x_cols
    b = biases[-1].reshape(D, 1)

    # ---- VMEM-aware tile sizing (per-generation budget: v7x has 64 MiB/TC, v5e/v6e 128).
    itemsize = jnp.dtype(x_nchw.dtype).itemsize
    try:
        vmem_cap = int(pltpu.get_tpu_info().vmem_capacity_bytes)
    except Exception:
        vmem_cap = 64 << 20                 # conservative fallback (v7x per-TC physical)
    vmem_limit = int(min((vmem_cap * 3) // 4, 96 << 20))
    tile_budget = (vmem_limit * 3) // 5     # headroom for compiler-internal scratch

    CG = _pick_channels_per_tile(C, M, D, itemsize, tile_budget)
    G = C // CG

    gamma = gammas[-1].reshape(G, 1, CG)
    beta = betas[-1].reshape(G, 1, CG)

    # Fold NCHW -> (D, C*M), columns ordered (c, n, h) so each grid tile holds CG
    # complete channels and BN statistics are tile-local.
    # TODO(synk): this transpose (and the inverse below) is a standalone XLA HBM copy;
    # plumb the (D, C*M) layout through the model or try allow_input_fusion.
    x2 = jnp.transpose(x_nchw, (3, 1, 0, 2)).reshape(D, C * M)

    out2 = pl.pallas_call(
        feature_block_kernel,
        out_shape=jax.ShapeDtypeStruct((Dh, C * M), x_nchw.dtype),
        grid=(G,),
        in_specs=[
            pl.BlockSpec((D, CG * M), lambda t: (0, t)),
            pl.BlockSpec((D, D), lambda t: (0, 0)),
            pl.BlockSpec((D, 1), lambda t: (0, 0)),
            pl.BlockSpec((None, 1, CG), lambda t: (t, 0, 0)),
            pl.BlockSpec((None, 1, CG), lambda t: (t, 0, 0)),
        ],
        out_specs=pl.BlockSpec((Dh, CG * M), lambda t: (0, t)),
        compiler_params=pltpu.CompilerParams(
            dimension_semantics=("parallel",),   # channel groups are independent
            vmem_limit_bytes=vmem_limit),
    )(x2, w, b, gamma, beta)

    return out2.reshape(Dh, C, N, H).transpose(2, 1, 3, 0)


def feature_block_ref(x_nchw, weights, biases, gammas, betas):
    """Plain-JAX reference of the same (fixed) semantics, in NCHW."""
    N, C, H, W = x_nchw.shape
    S = weights.shape[0]
    Dh = W // 2
    out = None
    for s in range(S):
        identity = x_nchw
        y = jnp.einsum('nchw,ow->ncho', x_nchw, weights[s]) + biases[s]
        mean = jnp.mean(y, axis=(0, 2, 3), keepdims=True)
        var = jnp.mean((y - mean) ** 2, axis=(0, 2, 3), keepdims=True)
        yn = (y - mean) * jax.lax.rsqrt(var + BN_EPS) \
            * gammas[s][None, :, None, None] + betas[s][None, :, None, None]
        glu = yn[..., :Dh] * jax.nn.sigmoid(yn[..., Dh:])
        out = (glu + identity[..., :Dh]) * SQRT_HALF
    return out


if __name__ == "__main__":
    # Small shapes consistent with the module:
    # input_size = 16  =>  C = W = 16; N = 2, H = 8; sub_block_size S = 2.
    input_size = 16
    N, C, H, W = 2, input_size, 8, input_size
    S = 2

    key = jax.random.PRNGKey(0)
    kx, kw, kb = jax.random.split(key, 3)

    x = jax.random.normal(kx, (N, C, H, W), dtype=jnp.float32)

    # Deterministic PyTorch-style init:
    # Linear: U(-1/sqrt(fan_in), 1/sqrt(fan_in)) for weight and bias;
    # BatchNorm2d: weight = 1, bias = 0.
    bound = 1.0 / math.sqrt(input_size)
    weights = jax.random.uniform(kw, (S, input_size, input_size),
                                 dtype=jnp.float32, minval=-bound, maxval=bound)
    biases = jax.random.uniform(kb, (S, input_size),
                                dtype=jnp.float32, minval=-bound, maxval=bound)
    gammas = jnp.ones((S, input_size), dtype=jnp.float32)
    betas = jnp.zeros((S, input_size), dtype=jnp.float32)

    out = feature_block(x, weights, biases, gammas, betas)
    out = jax.block_until_ready(out)

    ref = feature_block_ref(x, weights, biases, gammas, betas)
    ref = jax.block_until_ready(ref)

    assert out.shape == (N, C, H, W // 2), out.shape
    assert jnp.allclose(out, ref, rtol=1e-3, atol=1e-3), \
        f"max abs err = {jnp.max(jnp.abs(out - ref))}"

    print("KERNEL_OK")
</pallas_src>

<mosaic_0001>
module attributes {stable_mosaic.version = 11 : i64} {
  func.func @feature_block_kernel(%arg0: i32, %arg1: memref<16x256xf32, #tpu.memory_space<vmem>>, %arg2: memref<16x16xf32, #tpu.memory_space<vmem>>, %arg3: memref<16x1xf32, #tpu.memory_space<vmem>>, %arg4: memref<1x1x16xf32, #tpu.memory_space<vmem>>, %arg5: memref<1x1x16xf32, #tpu.memory_space<vmem>>, %arg6: memref<8x256xf32, #tpu.memory_space<vmem>>) attributes {dimension_semantics = [#tpu.dimension_semantics<parallel>], iteration_bounds = array<i64: 1>, scalar_prefetch = 0 : i64, scratch_operands = 0 : i64, tpu.core_type = #tpu.core_type<tc>, window_params = [{transform_indices = @transform_0, window_bounds = array<i64: 16, 256>}, {pipeline_mode = #tpu.pipeline_mode<synchronous>, transform_indices = @transform_1, window_bounds = array<i64: 16, 16>}, {pipeline_mode = #tpu.pipeline_mode<synchronous>, transform_indices = @transform_2, window_bounds = array<i64: 16, 1>}, {transform_indices = @transform_3, window_bounds = array<i64: 1, 1, 16>}, {transform_indices = @transform_4, window_bounds = array<i64: 1, 1, 16>}, {transform_indices = @transform_5, window_bounds = array<i64: 8, 256>}]} {
    %c0 = arith.constant 0 : index
    %c0_0 = arith.constant 0 : index
    %0 = vector.load %arg1[%c0, %c0_0] : memref<16x256xf32, #tpu.memory_space<vmem>>, vector<16x256xf32>
    %c0_1 = arith.constant 0 : index
    %c0_2 = arith.constant 0 : index
    %1 = vector.load %arg2[%c0_1, %c0_2] : memref<16x16xf32, #tpu.memory_space<vmem>>, vector<16x16xf32>
    %cst = arith.constant dense<0.000000e+00> : vector<16x256xf32>
    %2 = tpu.matmul %1, %0, %cst {dimension_numbers = #tpu.dot_dimension_numbers<[1], [0], [0], [1], [0, 0, 1, 1], [], []>} : vector<16x16xf32>, vector<16x256xf32>, vector<16x256xf32> -> vector<16x256xf32>
    %c0_3 = arith.constant 0 : index
    %c0_4 = arith.constant 0 : index
    %3 = vector.load %arg3[%c0_3, %c0_4] : memref<16x1xf32, #tpu.memory_space<vmem>>, vector<16x1xf32>
    %4 = vector.broadcast %3 : vector<16x1xf32> to vector<16x256xf32>
    %5 = arith.addf %2, %4 : vector<16x256xf32>
    %6 = tpu.iota {dimensions = array<i32: 0>} : vector<256x16xi32>
    %7 = tpu.iota {dimensions = array<i32: 1>} : vector<256x16xi32>
    %c16_i32 = arith.constant 16 : i32
    %8 = vector.broadcast %c16_i32 : i32 to vector<256x16xi32>
    %9 = arith.muli %7, %8 : vector<256x16xi32>
    %10 = arith.cmpi sge, %6, %9 : vector<256x16xi32>
    %c1_i32 = arith.constant 1 : i32
    %11 = vector.broadcast %c1_i32 : i32 to vector<256x16xi32>
    %12 = arith.addi %7, %11 : vector<256x16xi32>
    %c16_i32_5 = arith.constant 16 : i32
    %13 = vector.broadcast %c16_i32_5 : i32 to vector<256x16xi32>
    %14 = arith.muli %12, %13 : vector<256x16xi32>
    %15 = arith.cmpi slt, %6, %14 : vector<256x16xi32>
    %16 = arith.andi %10, %15 : vector<256x16xi1>
    %17 = arith.extui %16 : vector<256x16xi1> to vector<256x16xi32>
    %18 = arith.sitofp %17 : vector<256x16xi32> to vector<256x16xf32>
    %19 = tpu.iota {dimensions = array<i32: 0>} : vector<16x256xi32>
    %20 = tpu.iota {dimensions = array<i32: 1>} : vector<16x256xi32>
    %c16_i32_6 = arith.constant 16 : i32
    %21 = vector.broadcast %c16_i32_6 : i32 to vector<16x256xi32>
    %22 = arith.muli %19, %21 : vector<16x256xi32>
    %23 = arith.cmpi sge, %20, %22 : vector<16x256xi32>
    %c1_i32_7 = arith.constant 1 : i32
    %24 = vector.broadcast %c1_i32_7 : i32 to vector<16x256xi32>
    %25 = arith.addi %19, %24 : vector<16x256xi32>
    %c16_i32_8 = arith.constant 16 : i32
    %26 = vector.broadcast %c16_i32_8 : i32 to vector<16x256xi32>
    %27 = arith.muli %25, %26 : vector<16x256xi32>
    %28 = arith.cmpi slt, %20, %27 : vector<16x256xi32>
    %29 = arith.andi %23, %28 : vector<16x256xi1>
    %30 = arith.extui %29 : vector<16x256xi1> to vector<16x256xi32>
    %31 = arith.sitofp %30 : vector<16x256xi32> to vector<16x256xf32>
    %cst_9 = arith.constant dense<0.000000e+00> : vector<16x16xf32>
    %32 = tpu.matmul %5, %18, %cst_9 {dimension_numbers = #tpu.dot_dimension_numbers<[1], [0], [0], [1], [0, 0, 1, 1], [], []>} : vector<16x256xf32>, vector<256x16xf32>, vector<16x16xf32> -> vector<16x16xf32>
    %cst_10 = arith.constant dense<0.000000e+00> : vector<16xf32>
    %33 = vector.multi_reduction <add>, %32, %cst_10 [0] : vector<16x16xf32> to vector<16xf32>
    %34 = vector.shape_cast %33 : vector<16xf32> to vector<1x16xf32>
    %cst_11 = arith.constant 2.560000e+02 : f32
    %35 = vector.broadcast %cst_11 : f32 to vector<1x16xf32>
    %36 = arith.divf %34, %35 : vector<1x16xf32>
    %cst_12 = arith.constant dense<0.000000e+00> : vector<1x256xf32>
    %37 = tpu.matmul %36, %31, %cst_12 {dimension_numbers = #tpu.dot_dimension_numbers<[1], [0], [0], [1], [0, 0, 1, 1], [], []>} : vector<1x16xf32>, vector<16x256xf32>, vector<1x256xf32> -> vector<1x256xf32>
    %38 = vector.broadcast %37 : vector<1x256xf32> to vector<16x256xf32>
    %39 = arith.subf %5, %38 : vector<16x256xf32>
    %40 = arith.mulf %39, %39 : vector<16x256xf32>
    %cst_13 = arith.constant dense<0.000000e+00> : vector<16x16xf32>
    %41 = tpu.matmul %40, %18, %cst_13 {dimension_numbers = #tpu.dot_dimension_numbers<[1], [0], [0], [1], [0, 0, 1, 1], [], []>} : vector<16x256xf32>, vector<256x16xf32>, vector<16x16xf32> -> vector<16x16xf32>
    %cst_14 = arith.constant dense<0.000000e+00> : vector<16xf32>
    %42 = vector.multi_reduction <add>, %41, %cst_14 [0] : vector<16x16xf32> to vector<16xf32>
    %43 = vector.shape_cast %42 : vector<16xf32> to vector<1x16xf32>
    %cst_15 = arith.constant 2.560000e+02 : f32
    %44 = vector.broadcast %cst_15 : f32 to vector<1x16xf32>
    %45 = arith.divf %43, %44 : vector<1x16xf32>
    %cst_16 = arith.constant 9.99999974E-6 : f32
    %46 = vector.broadcast %cst_16 : f32 to vector<1x16xf32>
    %47 = arith.addf %45, %46 : vector<1x16xf32>
    %48 = math.rsqrt %47 : vector<1x16xf32>
    %c0_17 = arith.constant 0 : index
    %c0_18 = arith.constant 0 : index
    %c0_19 = arith.constant 0 : index
    %49 = vector.load %arg4[%c0_17, %c0_18, %c0_19] : memref<1x1x16xf32, #tpu.memory_space<vmem>>, vector<1x1x16xf32>
    %50 = vector.shape_cast %49 : vector<1x1x16xf32> to vector<1x16xf32>
    %51 = arith.mulf %50, %48 : vector<1x16xf32>
    %c0_20 = arith.constant 0 : index
    %c0_21 = arith.constant 0 : index
    %c0_22 = arith.constant 0 : index
    %52 = vector.load %arg5[%c0_20, %c0_21, %c0_22] : memref<1x1x16xf32, #tpu.memory_space<vmem>>, vector<1x1x16xf32>
    %53 = vector.shape_cast %52 : vector<1x1x16xf32> to vector<1x16xf32>
    %54 = tpu.concatenate %51, %53 in 0 : vector<1x16xf32>, vector<1x16xf32> -> vector<2x16xf32>
    %cst_23 = arith.constant dense<0.000000e+00> : vector<2x256xf32>
    %55 = tpu.matmul %54, %31, %cst_23 {dimension_numbers = #tpu.dot_dimension_numbers<[1], [0], [0], [1], [0, 0, 1, 1], [], []>} : vector<2x16xf32>, vector<16x256xf32>, vector<2x256xf32> -> vector<2x256xf32>
    %56 = vector.extract_strided_slice %55 {offsets = [0, 0], sizes = [1, 256], strides = [1, 1]} : vector<2x256xf32> to vector<1x256xf32>
    %57 = vector.broadcast %56 : vector<1x256xf32> to vector<16x256xf32>
    %58 = arith.mulf %39, %57 : vector<16x256xf32>
    %59 = vector.extract_strided_slice %55 {offsets = [1, 0], sizes = [1, 256], strides = [1, 1]} : vector<2x256xf32> to vector<1x256xf32>
    %60 = vector.broadcast %59 : vector<1x256xf32> to vector<16x256xf32>
    %61 = arith.addf %58, %60 : vector<16x256xf32>
    %62 = vector.extract_strided_slice %61 {offsets = [0, 0], sizes = [8, 256], strides = [1, 1]} : vector<16x256xf32> to vector<8x256xf32>
    %63 = vector.extract_strided_slice %61 {offsets = [8, 0], sizes = [8, 256], strides = [1, 1]} : vector<16x256xf32> to vector<8x256xf32>
    %64 = arith.negf %63 : vector<8x256xf32>
    %65 = math.exp %64 : vector<8x256xf32>
    %cst_24 = arith.constant 1.000000e+00 : f32
    %66 = vector.broadcast %cst_24 : f32 to vector<8x256xf32>
    %67 = arith.addf %66, %65 : vector<8x256xf32>
    %68 = arith.divf %66, %67 : vector<8x256xf32>
    %69 = arith.mulf %62, %68 : vector<8x256xf32>
    %70 = vector.extract_strided_slice %0 {offsets = [0, 0], sizes = [8, 256], strides = [1, 1]} : vector<16x256xf32> to vector<8x256xf32>
    %71 = arith.addf %69, %70 : vector<8x256xf32>
    %cst_25 = arith.constant 0.707106769 : f32
    %72 = vector.broadcast %cst_25 : f32 to vector<8x256xf32>
    %73 = arith.mulf %71, %72 : vector<8x256xf32>
    %c0_26 = arith.constant 0 : index
    %c0_27 = arith.constant 0 : index
    %74 = vector.load %arg6[%c0_26, %c0_27] : memref<8x256xf32, #tpu.memory_space<vmem>>, vector<8x256xf32>
    tpu.vector_store %arg6[%c0_26, %c0_27], %73 {strides = array<i32>} : memref<8x256xf32, #tpu.memory_space<vmem>>, vector<8x256xf32>,
    return
  }
  func.func @transform_0(%arg0: i32) -> (i32, i32) {
    %c0_i32 = arith.constant 0 : i32
    %c0_i32_0 = arith.constant 0 : i32
    return %c0_i32, %arg0 : i32, i32
  }
  func.func @transform_1(%arg0: i32) -> (i32, i32) {
    %c0_i32 = arith.constant 0 : i32
    %c0_i32_0 = arith.constant 0 : i32
    %c0_i32_1 = arith.constant 0 : i32
    return %c0_i32, %c0_i32_0 : i32, i32
  }
  func.func @transform_2(%arg0: i32) -> (i32, i32) {
    %c0_i32 = arith.constant 0 : i32
    %c0_i32_0 = arith.constant 0 : i32
    %c0_i32_1 = arith.constant 0 : i32
    return %c0_i32, %c0_i32_0 : i32, i32
  }
  func.func @transform_3(%arg0: i32) -> (i32, i32, i32) {
    %c0_i32 = arith.constant 0 : i32
    %c0_i32_0 = arith.constant 0 : i32
    %c0_i32_1 = arith.constant 0 : i32
    return %arg0, %c0_i32, %c0_i32_0 : i32, i32, i32
  }
  func.func @transform_4(%arg0: i32) -> (i32, i32, i32) {
    %c0_i32 = arith.constant 0 : i32
    %c0_i32_0 = arith.constant 0 : i32
    %c0_i32_1 = arith.constant 0 : i32
    return %arg0, %c0_i32, %c0_i32_0 : i32, i32, i32
  }
  func.func @transform_5(%arg0: i32) -> (i32, i32) {
    %c0_i32 = arith.constant 0 : i32
    %c0_i32_0 = arith.constant 0 : i32
    return %c0_i32, %arg0 : i32, i32
  }
}

</mosaic_0001>

<bundles_post_ra>
// kernel: tpu_custom_call.1
= control target key start
LH: loop header
LB: loop body
LE: loop exit
PB: predicated region body
PF: predicated region fallthrough
CT: control target
= control target key end

     0   :  { %10 = vsyncpa [#allocation3], 0  ;;  %s1733_s0 = inlined_call_operand.hbm [shape: f32[16,256], index: 0, kind: input, shape index: {}]   ;;  %s1734_s1 = inlined_call_operand.vmem [shape: f32[16,16], index: 1, kind: input, shape index: {}]   ;;  %s1735_s2 = inlined_call_operand.vmem [shape: f32[16,1], index: 2, kind: input, shape index: {}]   ;;  %s1736_s3 = inlined_call_operand.vmem [shape: f32[1,1,16], index: 3, kind: input, shape index: {}]   ;;  %s1737_s4 = inlined_call_operand.vmem [shape: f32[1,1,16], index: 4, kind: input, shape index: {}]   ;;  %s1738_s5 = inlined_call_operand.hbm [shape: f32[8,256], index: 5, kind: output, shape index: {}]  }
   0x1   :  { %11 = vsyncpa [#allocation4], 0  ;;  %s1102_s18 = smov [#allocation2]   ;;  %s1054_s22 = scalar_lea.hbm %s1733_s0, 512 }
   0x2   :  { %s17_s19 = sshll.u32 %s1102_s18, 4  ;;  %p1055_p0 = scmp.ne.s32.totalorder %s1733_s0, %s1054_s22  ;;  %s18_s19 = int_to_ptr.vmem [resolvable:$true] %s17_s19 }
   0x3   :  { %p1058_p1 = scmp.lt.u32.totalorder %s1054_s22, %s1733_s0 }
   0x5   :  { %p1060_p2 = pnand %p1058_p1, %p1055_p0 }
   0x7   :  { %1063 = shalt.err (!%p1060_p2)
}
   0x8   :  { %s1064_s27 = scalar_lea.vmem %s18_s19, 512  ;;  %p1069_p4 = scmp.lt.s32.totalorder %s18_s19, %s18_s19 }
   0x9   :  { %p1065_p3 = scmp.ne.s32.totalorder %s18_s19, %s1064_s27  ;;  %p1070_p5 = scmp.lt.s32.totalorder %s1064_s27, %s1064_s27 }
   0xb   :  { %p1071_p6 = por %p1070_p5, %p1069_p4 }
   0xd   :  { %p1072_p7 = pnand %p1071_p6, %p1065_p3 }
   0xf   :  { %1075 = shalt.err (!%p1072_p7)
}
  0x10   :  { %s1103_s28 = smov 256   ;;  %s1104_s29 = smov 16  }
  0x11   :  { %23 = dma.hbm_to_vmem [thread:$0]  %s1733_s0, 512, %s18_s19, [#allocation3], %s1103_s28, %s1103_s28, %s1104_s29  }
  0x12   :  { %1098 = dma.done.wait [#allocation3], 512  }
  0x13   :  { %1099 = vsyncadd [#allocation3], 4294966784  ;;  %v137_v0 = vlaneseq  ;;  %v1105_v1 = vmov 0.0   ;;  %v1106_v2 = vmov 0   ;;  %v1169_v11 = vld [vmem:[#allocation2 + $0x8] sm:$0xff]  ;;  %v38_v12 = vld [vmem:[#allocation2 + $0x18] sm:$0xff] }
  0x14   :  { %124 = vmatprep.mubr.f32.mxu1 %v1105_v1  ;;  %1043 = vset.pattern.permute.xlu0 %v1106_v2  ;;  %v1171_v13 = vld [vmem:[#allocation2] sm:$0xff]  ;;  %v960_v14 = vpack.c.bf16 %v38_v12, %v1169_v11  ;;  %v37_v15 = vld [vmem:[#allocation2 + $0x10] sm:$0xff]  ;;  %vm1741_vm10 = vcmask 130048   ;;  %v42_v23 = vld [vmem:[%s1735_s2 + $0x8] sm:$0xff]  ;;  %v1107_v25 = vmov 1.0|1.0  }
  0x15   :  { %v1152_v3 = vshrl.u32 %v137_v0, 7  ;;  %v1154_v4 = vand.u32 127, %v137_v0  ;;  %515 = vmatprep.mubr.f32.mxu0 %v1105_v1  ;;  %v962_v17 = vpack.c.bf16 %v37_v15, %v1171_v13  ;;  %v41_v18 = vld [vmem:[%s1735_s2] sm:$0xff]  ;;  %v1790_v26 = vmov 0  ;;  %v40_v30 = vld [vmem:[%s1734_s1 + $0x8] sm:$0xff] }
  0x16   :  { %961 = vmatprep.subr.bf16.mxu1 %v960_v14  ;;  %45 = vperm.xlu0 %1043, %v41_v18   ;;  %v39_v22 = vld [vmem:[%s1734_s1] sm:$0xff]  ;;  %v1792_v28 = vmov 0  ;;  %v1794_v31 = vmov 0  ;;  %v1796_v33 = vmov 0  ;;  %v1798_v35 = vmov 0 }
  0x17   :  { %v154_v5 = vadd.s32 128, %v1152_v3  ;;  %v155_v6 = vadd.s32 136, %v1152_v3  ;;  %v1160_v7 = vmul.u32 16, %v1154_v4  ;;  %v205_v8 = vadd.s32 1, %v1154_v4  ;;  %963 = vmatpush1.bf16.msra.mxu1 %v962_v17 }
  0x18   :  { %v1167_v10 = vadd.s32 8, %v1152_v3  ;;  %v156_v16 = vadd.s32 144, %v1152_v3  ;;  %v157_v20 = vadd.s32 152, %v1152_v3  ;;  %v140_v24 = vadd.s32 16, %v1152_v3 }
  0x19   :  { %vm189_vm0 = vcmp.ge.s32.totalorder %v154_v5, %v1160_v7  ;;  %v1164_v9 = vmul.u32 16, %v205_v8  ;;  %vm190_vm1 = vcmp.ge.s32.totalorder %v155_v6, %v1160_v7  ;;  %vm173_vm5 = vcmp.ge.s32.totalorder %v1152_v3, %v1160_v7 }
  0x1a   :  { %vm174_vm8 = vcmp.ge.s32.totalorder %v1167_v10, %v1160_v7  ;;  %vm191_vm13 = vcmp.ge.s32.totalorder %v156_v16, %v1160_v7  ;;  %v141_v27 = vadd.s32 24, %v1152_v3  ;;  %769 = vmatmul.mubr.msk.f32.vlgmr.msra.gmra.mrb[0].mxu1 %vm1741_vm10, %v39_v22  ;;  %50 = vperm.xlu0 %1043, %v42_v23   ;;  %v158_v29 = vadd.s32 160, %v1152_v3 }
  0x1b   :  { %vm223_vm2 = vcmp.lt.s32.totalorder %v154_v5, %v1164_v9  ;;  %vm224_vm3 = vcmp.lt.s32.totalorder %v155_v6, %v1164_v9  ;;  %vm207_vm6 = vcmp.lt.s32.totalorder %v1152_v3, %v1164_v9  ;;  %vm208_vm9 = vcmp.lt.s32.totalorder %v1167_v10, %v1164_v9  ;;  %130 = vmatprep.mubr.f32.mxu1 %v1105_v1 }
  0x1c   :  { %vm1182_vm4 = vmand %vm189_vm0, %vm223_vm2  ;;  %vm225_vm14 = vcmp.lt.s32.totalorder %v156_v16, %v1164_v9  ;;  %vm192_vm0 = vcmp.ge.s32.totalorder %v157_v20, %v1160_v7  ;;  %v159_v32 = vadd.s32 168, %v1152_v3  ;;  %v142_v34 = vadd.s32 32, %v1152_v3 }
  0x1d   :  { %vm1191_vm7 = vmand %vm190_vm1, %vm224_vm3  ;;  %vm226_vm1 = vcmp.lt.s32.totalorder %v157_v20, %v1164_v9  ;;  %v143_v36 = vadd.s32 40, %v1152_v3  ;;  %v1800_v37 = vmov 0  ;;  %v160_v38 = vadd.s32 176, %v1152_v3 }
  0x1e   :  { %vm1739_vm11 = vmpackc.low %vm1191_vm7, %vm1182_vm4  ;;  %770 = vmatmul.mubr.msk.f32.gmra.mrb[2].mxu1 %vm1741_vm10, %v40_v30  ;;  %vm194_vm10 = vcmp.ge.s32.totalorder %v159_v32, %v1160_v7  ;;  %v1802_v39 = vmov 0  ;;  %v161_v40 = vadd.s32 184, %v1152_v3  ;;  %v1804_v41 = vmov 0 }
  0x1f   :  { %965 = vmatprep.subr.msk.bf16.mxu1 %vm1739_vm11, %v1107_v25  ;;  %vm1222_vm12 = vmand %vm173_vm5, %vm207_vm6  ;;  %vm175_vm5 = vcmp.ge.s32.totalorder %v140_v24, %v1160_v7  ;;  %vm209_vm6 = vcmp.lt.s32.totalorder %v140_v24, %v1164_v9  ;;  %vm210_vm11 = vcmp.lt.s32.totalorder %v141_v27, %v1164_v9  ;;  %v144_v42 = vadd.s32 48, %v1152_v3 }
  0x20   :  { %v1791_v26 = vsel %vm1222_vm12, 4294967295, %v1790_v26  ;;  %vm1229_vm15 = vmand %vm174_vm8, %vm208_vm9  ;;  %vm176_vm9 = vcmp.ge.s32.totalorder %v141_v27, %v1160_v7  ;;  %v1806_v43 = vmov 0  ;;  %v145_v44 = vadd.s32 56, %v1152_v3 }
  0x21   :  { %v1793_v28 = vsel %vm1229_vm15, 4294967295, %v1792_v28  ;;  %vm1740_vm2 = vmpackc.low %vm1229_vm15, %vm1222_vm12  ;;  %vm228_vm12 = vcmp.lt.s32.totalorder %v159_v32, %v1164_v9  ;;  %v1808_v45 = vmov 0  ;;  %v162_v46 = vadd.s32 192, %v1152_v3 }
  0x22   :  { %967 = vmatpush3.bf16.msk.msra.mxu1 %vm1740_vm2, %v1107_v25  ;;  %vm1251_vm3 = vmand %vm191_vm13, %vm225_vm14  ;;  %v1810_v47 = vmov 0  ;;  %v163_v48 = vadd.s32 200, %v1152_v3  ;;  %v1812_v49 = vmov 0  ;;  %v146_v50 = vadd.s32 64, %v1152_v3 }
  0x23   :  { %v1795_v31 = vsel %vm1251_vm3, 4294967295, %v1794_v31  ;;  %vm1258_vm8 = vmand %vm192_vm0, %vm226_vm1  ;;  %vm193_vm0 = vcmp.ge.s32.totalorder %v158_v29, %v1160_v7  ;;  %vm227_vm1 = vcmp.lt.s32.totalorder %v158_v29, %v1164_v9  ;;  %v1814_v51 = vmov 0 }
  0x24   :  { %v1797_v33 = vsel %vm1258_vm8, 4294967295, %v1796_v33  ;;  %vm1743_vm13 = vmpackc.low %vm1258_vm8, %vm1251_vm3  ;;  %vm178_vm3 = vcmp.ge.s32.totalorder %v143_v36, %v1160_v7  ;;  %vm212_vm8 = vcmp.lt.s32.totalorder %v143_v36, %v1164_v9  ;;  %v147_v52 = vadd.s32 72, %v1152_v3 }
  0x25   :  { %969 = vmatprep.subr.msk.bf16.mxu1 %vm1743_vm13, %v1107_v25  ;;  %vm1276_vm14 = vmand %vm175_vm5, %vm209_vm6  ;;  %vm177_vm6 = vcmp.ge.s32.totalorder %v142_v34, %v1160_v7  ;;  %v1816_v53 = vmov 0  ;;  %v164_v54 = vadd.s32 208, %v1152_v3  ;;  %v1818_v55 = vmov 0 }
  0x26   :  { %v1799_v35 = vsel %vm1276_vm14, 4294967295, %v1798_v35  ;;  %vm1283_vm2 = vmand %vm176_vm9, %vm210_vm11  ;;  %vm211_vm9 = vcmp.lt.s32.totalorder %v142_v34, %v1164_v9  ;;  %v165_v56 = vadd.s32 216, %v1152_v3  ;;  %v1820_v57 = vmov 0 }
  0x27   :  { %v1801_v37 = vsel %vm1283_vm2, 4294967295, %v1800_v37  ;;  %vm1746_vm5 = vmpackc.low %vm1283_vm2, %vm1276_vm14  ;;  %vm196_vm14 = vcmp.ge.s32.totalorder %v161_v40, %v1160_v7  ;;  %vm230_vm2 = vcmp.lt.s32.totalorder %v161_v40, %v1164_v9  ;;  %v148_v58 = vadd.s32 80, %v1152_v3 }
  0x28   :  { %971 = vmatpush3.bf16.msk.msra.mxu1 %vm1746_vm5, %v1107_v25  ;;  %vm1300_vm11 = vmand %vm193_vm0, %vm227_vm1  ;;  %vm229_vm1 = vcmp.lt.s32.totalorder %v160_v38, %v1164_v9  ;;  %v1822_v59 = vmov 0  ;;  %v149_v60 = vadd.s32 88, %v1152_v3  ;;  %v1824_v61 = vmov 0 }
  0x29   :  { %v1803_v39 = vsel %vm1300_vm11, 4294967295, %v1802_v39  ;;  %vm1307_vm13 = vmand %vm194_vm10, %vm228_vm12  ;;  %vm195_vm12 = vcmp.ge.s32.totalorder %v160_v38, %v1160_v7  ;;  %v166_v62 = vadd.s32 224, %v1152_v3  ;;  %v1826_v63 = vmov 0 }
  0x2a   :  { %v1805_v41 = vsel %vm1307_vm13, 4294967295, %v1804_v41  ;;  %vm1749_vm0 = vmpackc.low %vm1307_vm13, %vm1300_vm11  ;;  %vm180_vm11 = vcmp.ge.s32.totalorder %v145_v44, %v1160_v7  ;;  %vm214_vm13 = vcmp.lt.s32.totalorder %v145_v44, %v1164_v9  ;;  %v167_v0 = vadd.s32 232, %v1152_v3 }
  0x2b   :  { %973 = vmatprep.subr.msk.bf16.mxu1 %vm1749_vm0, %v1107_v25  ;;  %vm1324_vm10 = vmand %vm177_vm6, %vm211_vm9  ;;  %vm213_vm9 = vcmp.lt.s32.totalorder %v144_v42, %v1164_v9  ;;  %v1828_v2 = vmov 0  ;;  %v150_v5 = vadd.s32 96, %v1152_v3  ;;  %v1830_v6 = vmov 0 }
  0x2c   :  { %v1807_v43 = vsel %vm1324_vm10, 4294967295, %v1806_v43  ;;  %vm1331_vm5 = vmand %vm178_vm3, %vm212_vm8  ;;  %vm179_vm8 = vcmp.ge.s32.totalorder %v144_v42, %v1160_v7  ;;  %v151_v8 = vadd.s32 104, %v1152_v3  ;;  %v1832_v12 = vmov 0 }
  0x2d   :  { %v1809_v45 = vsel %vm1331_vm5, 4294967295, %v1808_v45  ;;  %vm1752_vm6 = vmpackc.low %vm1331_vm5, %vm1324_vm10  ;;  %vm198_vm10 = vcmp.ge.s32.totalorder %v163_v48, %v1160_v7  ;;  %vm232_vm5 = vcmp.lt.s32.totalorder %v163_v48, %v1164_v9  ;;  %v1834_v14 = vmov 0 }
  0x2e   :  { %975 = vmatpush3.bf16.msk.msra.mxu1 %vm1752_vm6, %v1107_v25  ;;  %vm1348_vm3 = vmand %vm195_vm12, %vm229_vm1  ;;  %vm231_vm1 = vcmp.lt.s32.totalorder %v162_v46, %v1164_v9  ;;  %v1836_v15 = vmov 0  ;;  %v1838_v16 = vmov 0  ;;  %v1840_v17 = vmov 0 }
  0x2f   :  { %v1811_v47 = vsel %vm1348_vm3, 4294967295, %v1810_v47  ;;  %vm1355_vm0 = vmand %vm196_vm14, %vm230_vm2  ;;  %vm197_vm14 = vcmp.ge.s32.totalorder %v162_v46, %v1160_v7  ;;  %v168_v18 = vadd.s32 240, %v1152_v3  ;;  %v169_v20 = vadd.s32 248, %v1152_v3 }
  0x30   :  { %v1813_v49 = vsel %vm1355_vm0, 4294967295, %v1812_v49  ;;  %vm1755_vm12 = vmpackc.low %vm1355_vm0, %vm1348_vm3  ;;  %vm182_vm3 = vcmp.ge.s32.totalorder %v147_v52, %v1160_v7  ;;  %vm216_vm0 = vcmp.lt.s32.totalorder %v147_v52, %v1164_v9  ;;  %v152_v22 = vadd.s32 112, %v1152_v3 }
  0x31   :  { %977 = vmatprep.subr.msk.bf16.mxu1 %vm1755_vm12, %v1107_v25  ;;  %vm1372_vm2 = vmand %vm179_vm8, %vm213_vm9  ;;  %vm215_vm9 = vcmp.lt.s32.totalorder %v146_v50, %v1164_v9  ;;  %v153_v23 = vadd.s32 120, %v1152_v3  ;;  %v1842_v24 = vmov 0  ;;  %v1844_v27 = vmov 0 }
  0x32   :  { %v1815_v51 = vsel %vm1372_vm2, 4294967295, %v1814_v51  ;;  %vm1379_vm6 = vmand %vm180_vm11, %vm214_vm13  ;;  %vm181_vm11 = vcmp.ge.s32.totalorder %v146_v50, %v1160_v7  ;;  %v1846_v29 = vmov 0  ;;  %v342_v48 = vadd.s32 1, %v1152_v3 }
  0x33   :  { %v1817_v53 = vsel %vm1379_vm6, 4294967295, %v1816_v53  ;;  %vm1758_vm8 = vmpackc.low %vm1379_vm6, %vm1372_vm2  ;;  %vm200_vm2 = vcmp.ge.s32.totalorder %v165_v56, %v1160_v7  ;;  %vm234_vm6 = vcmp.lt.s32.totalorder %v165_v56, %v1164_v9  ;;  %v343_v50 = vadd.s32 1, %v1167_v10 }
  0x34   :  { %979 = vmatpush3.bf16.msk.msra.mxu1 %vm1758_vm8, %v1107_v25  ;;  %vm1396_vm13 = vmand %vm197_vm14, %vm231_vm1  ;;  %vm233_vm1 = vcmp.lt.s32.totalorder %v164_v54, %v1164_v9  ;;  %v335_v52 = vadd.s32 128, %v1154_v4  ;;  %v337_v56 = vmul.u32 16, %v1167_v10 }
  0x35   :  { %v1819_v55 = vsel %vm1396_vm13, 4294967295, %v1818_v55  ;;  %vm1403_vm12 = vmand %vm198_vm10, %vm232_vm5  ;;  %vm199_vm10 = vcmp.ge.s32.totalorder %v164_v54, %v1160_v7  ;;  %v336_v54 = vmul.u32 16, %v1152_v3 }
  0x36   :  { %v1821_v57 = vsel %vm1403_vm12, 4294967295, %v1820_v57  ;;  %vm1761_vm14 = vmpackc.low %vm1403_vm12, %vm1396_vm13  ;;  %vm184_vm13 = vcmp.ge.s32.totalorder %v149_v60, %v1160_v7  ;;  %vm218_vm12 = vcmp.lt.s32.totalorder %v149_v60, %v1164_v9  ;;  %v345_v60 = vmul.u32 16, %v343_v50 }
  0x37   :  { %981 = vmatprep.subr.msk.bf16.mxu1 %vm1761_vm14, %v1107_v25  ;;  %vm1420_vm5 = vmand %vm181_vm11, %vm215_vm9  ;;  %vm217_vm9 = vcmp.lt.s32.totalorder %v148_v58, %v1164_v9 }
  0x38   :  { %v1823_v59 = vsel %vm1420_vm5, 4294967295, %v1822_v59  ;;  %vm1427_vm8 = vmand %vm182_vm3, %vm216_vm0  ;;  %vm183_vm3 = vcmp.ge.s32.totalorder %v148_v58, %v1160_v7  ;;  %v344_v58 = vmul.u32 16, %v342_v48 }
  0x39   :  { %v1825_v61 = vsel %vm1427_vm8, 4294967295, %v1824_v61  ;;  %vm1764_vm11 = vmpackc.low %vm1427_vm8, %vm1420_vm5  ;;  %vm202_vm5 = vcmp.ge.s32.totalorder %v167_v0, %v1160_v7  ;;  %vm236_vm8 = vcmp.lt.s32.totalorder %v167_v0, %v1164_v9 }
  0x3a   :  { %983 = vmatpush3.bf16.msk.msra.mxu1 %vm1764_vm11, %v1107_v25  ;;  %vm1444_vm0 = vmand %vm199_vm10, %vm233_vm1  ;;  %vm235_vm1 = vcmp.lt.s32.totalorder %v166_v62, %v1164_v9 }
  0x3b   :  { %v1827_v63 = vsel %vm1444_vm0, 4294967295, %v1826_v63  ;;  %vm1451_vm14 = vmand %vm200_vm2, %vm234_vm6  ;;  %vm201_vm2 = vcmp.ge.s32.totalorder %v166_v62, %v1160_v7 }
  0x3c   :  { %v1829_v2 = vsel %vm1451_vm14, 4294967295, %v1828_v2  ;;  %vm1767_vm10 = vmpackc.low %vm1451_vm14, %vm1444_vm0  ;;  %vm186_vm0 = vcmp.ge.s32.totalorder %v151_v8, %v1160_v7  ;;  %vm220_vm14 = vcmp.lt.s32.totalorder %v151_v8, %v1164_v9 }
  0x3d   :  { %985 = vmatprep.subr.msk.bf16.mxu1 %vm1767_vm10, %v1107_v25  ;;  %vm1468_vm6 = vmand %vm183_vm3, %vm217_vm9  ;;  %vm219_vm9 = vcmp.lt.s32.totalorder %v150_v5, %v1164_v9 }
  0x3e   :  { %v1831_v6 = vsel %vm1468_vm6, 4294967295, %v1830_v6  ;;  %vm1475_vm11 = vmand %vm184_vm13, %vm218_vm12  ;;  %vm185_vm13 = vcmp.ge.s32.totalorder %v150_v5, %v1160_v7 }
  0x3f   :  { %v1833_v12 = vsel %vm1475_vm11, 4294967295, %v1832_v12  ;;  %vm1772_vm3 = vmpackc.low %vm1475_vm11, %vm1468_vm6 }
  0x40   :  { %987 = vmatpush3.bf16.msk.msra.mxu1 %vm1772_vm3, %v1107_v25  ;;  %vm1491_vm12 = vmand %vm201_vm2, %vm235_vm1  ;;  %vm221_vm3 = vcmp.lt.s32.totalorder %v152_v22, %v1164_v9 }
  0x41   :  { %v1835_v14 = vsel %vm1491_vm12, 4294967295, %v1834_v14  ;;  %vm1497_vm10 = vmand %vm202_vm5, %vm236_vm8 }
  0x42   :  { %v1837_v15 = vsel %vm1497_vm10, 4294967295, %v1836_v15  ;;  %vm1770_vm2 = vmpackc.low %vm1497_vm10, %vm1491_vm12  ;;  %vm222_vm12 = vcmp.lt.s32.totalorder %v153_v23, %v1164_v9 }
  0x43   :  { %989 = vmatprep.subr.msk.bf16.mxu1 %vm1770_vm2, %v1107_v25  ;;  %vm1513_vm8 = vmand %vm185_vm13, %vm219_vm9  ;;  %vm237_vm13 = vcmp.lt.s32.totalorder %v168_v18, %v1164_v9  ;;  %vm238_vm9 = vcmp.lt.s32.totalorder %v169_v20, %v1164_v9 }
  0x44   :  { %v1839_v16 = vsel %vm1513_vm8, 4294967295, %v1838_v16  ;;  %vm1517_vm5 = vmand %vm186_vm0, %vm220_vm14  ;;  %vm203_vm14 = vcmp.ge.s32.totalorder %v168_v18, %v1160_v7  ;;  %vm204_vm0 = vcmp.ge.s32.totalorder %v169_v20, %v1160_v7 }
  0x45   :  { %v1841_v17 = vsel %vm1517_vm5, 4294967295, %v1840_v17  ;;  %vm1771_vm1 = vmpackc.low %vm1517_vm5, %vm1513_vm8  ;;  %vm188_vm5 = vcmp.ge.s32.totalorder %v153_v23, %v1160_v7 }
  0x46   :  { %991 = vmatpush3.bf16.msk.msra.mxu1 %vm1771_vm1, %v1107_v25  ;;  %vm1539_vm2 = vmand %vm203_vm14, %vm237_vm13  ;;  %vm187_vm1 = vcmp.ge.s32.totalorder %v152_v22, %v1160_v7  ;;  %v1848_v7 = vmov 0 }
  0x47   :  { %v1843_v24 = vsel %vm1539_vm2, 4294967295, %v1842_v24  ;;  %vm1545_vm8 = vmand %vm204_vm0, %vm238_vm9 }
  0x48   :  { %v1845_v27 = vsel %vm1545_vm8, 4294967295, %v1844_v27  ;;  %vm1777_vm14 = vmpackc.low %vm1545_vm8, %vm1539_vm2  ;;  %vm340_vm2 = vcmp.ge.s32.totalorder %v1154_v4, %v337_v56  ;;  %vm348_vm8 = vcmp.lt.s32.totalorder %v1154_v4, %v345_v60 }
  0x49   :  { %993 = vmatprep.subr.msk.bf16.mxu1 %vm1777_vm14, %v1107_v25  ;;  %vm1561_vm0 = vmand %vm187_vm1, %vm221_vm3  ;;  %vm339_vm3 = vcmp.ge.s32.totalorder %v335_v52, %v336_v54  ;;  %vm349_vm1 = vcmp.lt.s32.totalorder %v335_v52, %v345_v60  ;;  %vm338_vm14 = vcmp.ge.s32.totalorder %v1154_v4, %v336_v54 }
  0x4a   :  { %v1847_v29 = vsel %vm1561_vm0, 4294967295, %v1846_v29  ;;  %vm1565_vm13 = vmand %vm188_vm5, %vm222_vm12  ;;  %vm341_vm12 = vcmp.ge.s32.totalorder %v335_v52, %v337_v56  ;;  %vm347_vm5 = vcmp.lt.s32.totalorder %v335_v52, %v344_v58 }
  0x4b   :  { %v1849_v7 = vsel %vm1565_vm13, 4294967295, %v1848_v7  ;;  %vm1776_vm9 = vmpackc.low %vm1565_vm13, %vm1561_vm0  ;;  %vm346_vm0 = vcmp.lt.s32.totalorder %v1154_v4, %v344_v58 }
  0x4c   :  { %995 = vmatpush3.bf16.msk.msra.mxu1 %vm1776_vm9, %v1107_v25  ;;  %vm351_vm9 = vmand %vm339_vm3, %vm347_vm5  ;;  %vm1864_vm5 = vnez %v1803_v39 }
  0x4d   :  { %vm353_vm13 = vmand %vm341_vm12, %vm349_vm1  ;;  %vm1863_vm12 = vnez %v1805_v41 }
  0x4e   :  { %vm996_vm10 = vmpackc.low %vm353_vm13, %vm351_vm9  ;;  %vm1861_vm13 = vnez %v1799_v35 }
  0x4f   :  { %997 = vmatprep.subr.msk.bf16.mxu0 %vm996_vm10, %v1107_v25  ;;  %vm350_vm6 = vmand %vm338_vm14, %vm346_vm0  ;;  %1033 = vmatprep.subr.msk.bf16.mxu1 %vm996_vm10, %v1107_v25  ;;  %vm1851_vm10 = vcmask 130048   ;;  %vm1860_vm0 = vnez %v1801_v37 }
  0x50   :  { %vm352_vm11 = vmand %vm340_vm2, %vm348_vm8  ;;  %vm1857_vm2 = vnez %v1797_v33  ;;  %vm1858_vm8 = vnez %v1795_v31 }
  0x51   :  { %vm998_vm15 = vmpackc.low %vm352_vm11, %vm350_vm6 }
  0x52   :  { %999 = vmatpush1.bf16.msk.msra.mxu0 %vm998_vm15, %v1107_v25  ;;  %vm1850_vm3 = vmpackc.low %vm1191_vm7, %vm1182_vm4  ;;  %vm1854_vm7 = vnez %v1793_v28 }
  0x53   :  { %1001 = vmatprep.subr.msk.bf16.mxu0 %vm1850_vm3, %v1107_v25  ;;  %vm1852_vm11 = vmmov %vm1851_vm10  ;;  %vm1866_vm3 = vnez %v1809_v45 }
  0x54   :  { %vm1853_vm4 = vmmov %vm1851_vm10 }
  0x55   :  { %vm1859_vm14 = vmpackc.low %vm1857_vm2, %vm1858_vm8  ;;  %vm1873_vm2 = vnez %v1815_v51 }
  0x56   :  { %vm1862_vm9 = vmpackc.low %vm1860_vm0, %vm1861_vm13  ;;  %vm1876_vm0 = vnez %v1819_v55 }
  0x57   :  { %vm1865_vm1 = vmpackc.low %vm1863_vm12, %vm1864_vm5  ;;  %vm1879_vm12 = vnez %v1823_v59 }
  0x95   :  { %v46_v9 = vpop.permute.xlu0 %45 }
  0x99   :  { %v51_v40 = vpop.permute.xlu0 %50 }
  0xed   :  { %v126_v30 = vpop.f32.mrb[0].mxu1 }
  0xee   :  { %v128_v32 = vpop.f32.mrb[1].mxu1  ;;  %v1581_v36 = vadd.f32 %v126_v30, %v46_v9 }
  0xef   :  { %v1579_v34 = vadd.f32 %v128_v32, %v46_v9 }
  0xf1   :  { %v132_v38 = vpop.f32.mrb[2].mxu1  ;;  %426 = vmatprep.mubr.f32.mxu1 %v1579_v34 }
  0xf2   :  { %v134_v42 = vpop.f32.mrb[3].mxu1  ;;  %427 = vmatmul.mubr.f32.vlgmr.msra.gmra.mrb[4].mxu1 %v1581_v36  ;;  %v1587_v46 = vadd.f32 %v132_v38, %v51_v40 }
  0xf3   :  { %v1585_v44 = vadd.f32 %v134_v42, %v51_v40  ;;  %1035 = vmatpush1.bf16.msk.msra.mxu1 %vm998_vm15, %v1107_v25  ;;  %vm1855_vm15 = vnez %v1791_v26  ;;  %v524_v26 = vsub.s32 0, %v1152_v3  ;;  %v724_v42 = vsub.s32 1, %v1152_v3 }
  0xf4   :  { %vm1856_vm6 = vmpackc.low %vm1854_vm7, %vm1855_vm15  ;;  %vm1870_vm7 = vnez %v1811_v47 }
  0xf5   :  { %431 = vmatprep.mubr.f32.mxu1 %v1585_v44 }
  0xf6   :  { %432 = vmatmul.mubr.f32.gmra.mrb[6].mxu1 %v1587_v46 }
  0xf7   :  { %703 = vmatprep.mubr.f32.mxu1 %v1105_v1 }
 0x1c5   :  { %v916_v1 = vpop.f32.mrb[4].mxu1 }
 0x1c6   :  { %v917_v4 = vpop.f32.mrb[5].mxu1 }
 0x1c7   :  { %v918_v10 = vadd.f32 %v917_v4, %v916_v1 }
 0x1c9   :  { %v919_v62 = vpop.f32.mrb[6].mxu1  ;;  %v437_v8 = vsel %vm1851_vm10, %v918_v10, 0.0  ;;  %vm1867_vm10 = vnez %v1807_v43 }
 0x1ca   :  { %v920_v0 = vpop.f32.mrb[7].mxu1 }
 0x1cb   :  { %v921_v5 = vadd.f32 %v920_v0, %v919_v62 }
 0x1cd   :  { %v438_v18 = vsel %vm1852_vm11, %v921_v5, 0.0  ;;  %vm1868_vm11 = vmpackc.low %vm1866_vm3, %vm1867_vm10  ;;  %vm1882_vm3 = vnez %v1827_v63 }
 0x1ce   :  { %v439_v20 = vadd.f32 %v438_v18, %v437_v8 }
 0x1d0   :  { %v440_v22 = vrot.slane %v439_v20, 4 }
 0x1d2   :  { %v441_v23 = vadd.f32 %v440_v22, %v439_v20 }
 0x1d4   :  { %v442_v9 = vrot.slane %v441_v23, 2 }
 0x1d6   :  { %v443_v30 = vadd.f32 %v442_v9, %v441_v23 }
 0x1d8   :  { %v444_v21 = vrot.slane %v443_v30, 1 }
 0x1da   :  { %v445_v32 = vadd.f32 %v444_v21, %v443_v30 }
 0x1dc   :  { %v447_v19 = vmul.f32 0.00390625, %v445_v32 }
 0x1de   :  { %843 = vmatmul.mubr.msk.f32.vlgmr.msra.gmra.mrb[0].mxu0 %vm1853_vm4, %v447_v19  ;;  %vm1869_vm4 = vnez %v1813_v49 }
 0x1df   :  { %1003 = vmatpush3.bf16.msk.msra.mxu0 %vm1856_vm6, %v1107_v25  ;;  %vm1871_vm15 = vmpackc.low %vm1869_vm4, %vm1870_vm7  ;;  %vm1872_vm6 = vnez %v1817_v53  ;;  %vm1885_vm4 = vnez %v1831_v6 }
 0x1e0   :  { %1005 = vmatprep.subr.msk.bf16.mxu0 %vm1859_vm14, %v1107_v25  ;;  %vm1874_vm8 = vmpackc.low %vm1872_vm6, %vm1873_vm2  ;;  %vm1875_vm14 = vnez %v1821_v57  ;;  %vm1888_vm6 = vnez %v1835_v14 }
 0x1e1   :  { %vm1877_vm13 = vmpackc.low %vm1875_vm14, %vm1876_vm0  ;;  %vm1891_vm14 = vnez %v1839_v16 }
 0x1e3   :  { %1007 = vmatpush3.bf16.msk.msra.mxu0 %vm1862_vm9, %v1107_v25  ;;  %vm1878_vm9 = vnez %v1825_v61 }
 0x1e4   :  { %1009 = vmatprep.subr.msk.bf16.mxu0 %vm1865_vm1, %v1107_v25  ;;  %vm1880_vm5 = vmpackc.low %vm1878_vm9, %vm1879_vm12  ;;  %vm1881_vm1 = vnez %v1829_v2  ;;  %vm1894_vm9 = vnez %v1843_v24 }
 0x1e5   :  { %vm1883_vm10 = vmpackc.low %vm1881_vm1, %vm1882_vm3  ;;  %vm1897_vm1 = vnez %v1847_v29 }
 0x1e7   :  { %1011 = vmatpush3.bf16.msk.msra.mxu0 %vm1868_vm11, %v1107_v25  ;;  %vm1884_vm11 = vnez %v1833_v12 }
 0x1e8   :  { %1013 = vmatprep.subr.msk.bf16.mxu0 %vm1871_vm15, %v1107_v25  ;;  %vm1886_vm7 = vmpackc.low %vm1884_vm11, %vm1885_vm4  ;;  %vm1887_vm15 = vnez %v1837_v15  ;;  %vm634_vm4 = vcmask 1040384  }
 0x1e9   :  { %vm1889_vm2 = vmpackc.low %vm1887_vm15, %vm1888_vm6 }
 0x1eb   :  { %1015 = vmatpush3.bf16.msk.msra.mxu0 %vm1874_vm8, %v1107_v25  ;;  %vm1890_vm8 = vnez %v1841_v17 }
 0x1ec   :  { %1017 = vmatprep.subr.msk.bf16.mxu0 %vm1877_vm13, %v1107_v25  ;;  %vm1892_vm0 = vmpackc.low %vm1890_vm8, %vm1891_vm14  ;;  %vm1893_vm13 = vnez %v1845_v27 }
 0x1ed   :  { %vm1895_vm12 = vmpackc.low %vm1893_vm13, %vm1894_vm9 }
 0x1ef   :  { %1019 = vmatpush3.bf16.msk.msra.mxu0 %vm1880_vm5, %v1107_v25  ;;  %vm1896_vm5 = vnez %v1849_v7  ;;  %v625_v7 = vld [vmem:[%s1736_s3] sm:$0x1]  ;;  %s1108_s3 = smov [#allocation5]  }
 0x1f0   :  { %1021 = vmatprep.subr.msk.bf16.mxu0 %vm1883_vm10, %v1107_v25  ;;  %vm1898_vm3 = vmpackc.low %vm1896_vm5, %vm1897_vm1  ;;  %vm1899_vm10 = vcmask 130048  }
 0x1f1   :  { %vm1900_vm11 = vmmov %vm1899_vm10 }
 0x1f3   :  { %1023 = vmatpush3.bf16.msk.msra.mxu0 %vm1886_vm7, %v1107_v25  ;;  %vm1901_vm7 = vmmov %vm1899_vm10 }
 0x1f4   :  { %1025 = vmatprep.subr.msk.bf16.mxu0 %vm1889_vm2, %v1107_v25 }
 0x1f7   :  { %1027 = vmatpush3.bf16.msk.msra.mxu0 %vm1892_vm0, %v1107_v25 }
 0x1f8   :  { %1029 = vmatprep.subr.msk.bf16.mxu0 %vm1895_vm12, %v1107_v25 }
 0x1fb   :  { %1031 = vmatpush3.bf16.msk.msra.mxu0 %vm1898_vm3, %v1107_v25 }
 0x2b1   :  { %v517_v28 = vpop.f32.mrb[0].mxu0 }
 0x2b2   :  { %v525_v31 = vrot.slane %v517_v28, %v524_v26  ;;  %v519_v33 = vpop.f32.mrb[1].mxu0 }
 0x2b3   :  { %v529_v35 = vrot.slane %v519_v33, %v524_v26 }
 0x2b4   :  { %v530_v37 = vsub.f32 %v1581_v36, %v525_v31  ;;  %v532_v45 = vsub.f32 %v1587_v46, %v525_v31  ;;  %v876_v36 = vld [vmem:[%s1737_s4] ss:$0 sm:$0xff]  ;;  %s760_s4 = sshll.u32 %s1108_s3, 4  ;;  %s761_s4 = int_to_ptr.vmem [resolvable:$true] %s760_s4 }
 0x2b5   :  { %v531_v39 = vsub.f32 %v1579_v34, %v529_v35  ;;  %v533_v41 = vsub.f32 %v1585_v44, %v529_v35  ;;  %s1076_s16 = scalar_lea.vmem %s761_s4, 256  ;;  %p1081_p9 = scmp.lt.s32.totalorder %s761_s4, %s761_s4 }
 0x2b6   :  { %v534_v47 = vmul.f32 %v530_v37, %v530_v37  ;;  %v536_v25 = vmul.f32 %v532_v45, %v532_v45  ;;  %p1077_p8 = scmp.ne.s32.totalorder %s761_s4, %s1076_s16  ;;  %p1082_p10 = scmp.lt.s32.totalorder %s1076_s16, %s1076_s16 }
 0x2b7   :  { %v535_v43 = vmul.f32 %v531_v39, %v531_v39  ;;  %v537_v49 = vmul.f32 %v533_v41, %v533_v41 }
 0x2b8   :  { %p1083_p11 = por %p1082_p10, %p1081_p9 }
 0x2b9   :  { %602 = vmatprep.mubr.f32.mxu0 %v535_v43 }
 0x2ba   :  { %603 = vmatmul.mubr.f32.vlgmr.msra.gmra.mrb[2].mxu0 %v534_v47  ;;  %p1084_p12 = pnand %p1083_p11, %p1077_p8 }
 0x2bb   :  { %607 = vmatprep.mubr.f32.mxu0 %v537_v49 }
 0x2be   :  { %608 = vmatmul.mubr.f32.gmra.mrb[4].mxu0 %v536_v25 }
 0x38d   :  { %v954_v51 = vpop.f32.mrb[2].mxu0 }
 0x38e   :  { %v955_v53 = vpop.f32.mrb[3].mxu0 }
 0x38f   :  { %v956_v55 = vadd.f32 %v955_v53, %v954_v51 }
 0x391   :  { %v957_v57 = vpop.f32.mrb[4].mxu0  ;;  %v613_v63 = vsel %vm1899_vm10, %v956_v55, 0.0 }
 0x392   :  { %v958_v59 = vpop.f32.mrb[5].mxu0 }
 0x393   :  { %v959_v61 = vadd.f32 %v958_v59, %v957_v57 }
 0x395   :  { %v614_v2 = vsel %vm1900_vm11, %v959_v61, 0.0 }
 0x396   :  { %v615_v6 = vadd.f32 %v614_v2, %v613_v63 }
 0x398   :  { %v616_v12 = vrot.slane %v615_v6, 4 }
 0x39a   :  { %v617_v14 = vadd.f32 %v616_v12, %v615_v6 }
 0x39c   :  { %v618_v15 = vrot.slane %v617_v14, 2 }
 0x39e   :  { %v619_v16 = vadd.f32 %v618_v15, %v617_v14 }
 0x3a0   :  { %v620_v17 = vrot.slane %v619_v16, 1 }
 0x3a2   :  { %v621_v24 = vadd.f32 %v620_v17, %v619_v16 }
 0x3a4   :  { %v622_v27 = vmul.f32 0.00390625, %v621_v24 }
 0x3a6   :  { %v623_v29 = vadd.f32 1e-05, %v622_v27 }
 0x3a8   :  { %1044 = vrsqrt.f32 %v623_v29 }
 0x3b2   :  { %v1045_v34 = vpop.eup %1044 }
 0x3b3   :  { %v626_v38 = vmul.f32 %v1045_v34, %v625_v7 }
 0x3b5   :  { %v635_v40 = vsel %vm634_vm4, %v626_v38, %v876_v36 }
 0x3b6   :  { %881 = vmatmul.mubr.msk.f32.vlgmr.msra.gmra.mrb[8].mxu1 %vm1901_vm7, %v635_v40 }
 0x489   :  { %v705_v44 = vpop.f32.mrb[8].mxu1 }
 0x48a   :  { %v713_v46 = vrot.slane %v705_v44, %v524_v26  ;;  %v707_v48 = vpop.f32.mrb[9].mxu1  ;;  %v725_v54 = vrot.slane %v705_v44, %v724_v42 }
 0x48b   :  { %v717_v50 = vrot.slane %v707_v48, %v524_v26  ;;  %v729_v58 = vrot.slane %v707_v48, %v724_v42 }
 0x48c   :  { %v720_v52 = vmul.f32 %v713_v46, %v532_v45  ;;  %v718_v3 = vmul.f32 %v713_v46, %v530_v37 }
 0x48d   :  { %v721_v56 = vmul.f32 %v717_v50, %v533_v41  ;;  %v719_v18 = vmul.f32 %v717_v50, %v531_v39 }
 0x48e   :  { %v732_v60 = vadd.f32 %v725_v54, %v720_v52  ;;  %v730_v20 = vadd.f32 %v725_v54, %v718_v3 }
 0x48f   :  { %v733_v1 = vadd.f32 %v729_v58, %v721_v56  ;;  %v731_v23 = vadd.f32 %v729_v58, %v719_v18 }
 0x490   :  { %v882_v4 = vmul.f32 -1.442695, %v732_v60 }
 0x491   :  { %v883_v10 = vmul.f32 -1.442695, %v733_v1 }
 0x492   :  { %1046 = vpow2.f32 %v882_v4 }
 0x493   :  { %1048 = vpow2.f32 %v883_v10 }
 0x49c   :  { %v1047_v62 = vpop.eup %1046 }
 0x49d   :  { %v1049_v0 = vpop.eup %1048  ;;  %v740_v5 = vadd.f32 1.0, %v1047_v62 }
 0x49e   :  { %v741_v8 = vadd.f32 1.0, %v1049_v0 }
 0x49f   :  { %1050 = vrcp.f32 %v740_v5 }
 0x4a0   :  { %1052 = vrcp.f32 %v741_v8 }
 0x4a9   :  { %v1051_v22 = vpop.eup %1050 }
 0x4aa   :  { %v1053_v9 = vpop.eup %1052  ;;  %v746_v30 = vmul.f32 %v1051_v22, %v730_v20 }
 0x4ab   :  { %v747_v21 = vmul.f32 %v1053_v9, %v731_v23 }
 0x4ac   :  { %v748_v32 = vadd.f32 %v746_v30, %v1171_v13 }
 0x4ad   :  { %v749_v19 = vadd.f32 %v747_v21, %v1169_v11 }
 0x4ae   :  { %v750_v26 = vmul.f32 0.70710677, %v748_v32 }
 0x4af   :  { %v751_v28 = vmul.f32 0.70710677, %v749_v19 }
 0x4b0   :  { %752 = vst [vmem:[#allocation5] sm:$0xff] %v750_v26 }
 0x4b1   :  { %753 = vst [vmem:[#allocation5 + $0x8] sm:$0xff] %v751_v28 }
 0x4b2   :  { %1087 = shalt.err (!%p1084_p12)
}
 0x4b3   :  { %s1088_s19 = scalar_lea.hbm %s1738_s5, 256 }
 0x4b4   :  { %p1089_p13 = scmp.ne.s32.totalorder %s1738_s5, %s1088_s19  ;;  %p1092_p0 = scmp.lt.u32.totalorder %s1088_s19, %s1738_s5 }
 0x4b6   :  { %p1094_p1 = pnand %p1092_p0, %p1089_p13 }
 0x4b8   :  { %1097 = shalt.err (!%p1094_p1)
}
 0x4b9   :  { %763 = dma.vmem_to_hbm [thread:$0]  %s761_s4, 256, %s1738_s5, [#allocation4]  }
 0x4ba   :  { %1100 = dma.done.wait [#allocation4], 256  }
 0x4bb   :  { %1101 = vsyncadd [#allocation4], 4294967040 }
 0x4bc   :  { %767 = vsyncpa [#allocation3], 1 }
 0x4bd   :  { %768 = vsyncpa [#allocation4], 1 }

</bundles_post_ra>
